<compile_context>
chip_gen: v5e
topology: v5e:2x2
jax: 0.10.0
libtpu: 0.0.40
codegen_flags: <defaults>
</compile_context>

<pallas_src>
import functools

import jax
import jax.numpy as jnp
from jax import lax
from jax.experimental import pallas as pl
from jax.experimental.pallas import tpu as pltpu


def _round_up(x, m):
    return (x + m - 1) // m * m


def _conv1d_kernel(*refs, K, pad_l, pad_r, KH, TL, L, ragged, halo_resident):
    """One (batch, seq-tile) block per grid step.

    refs (KH > 0): x_ref (1,TL,Cin), halo_ref (1,T|1,KH,Cin),
                   w_ref (K,Cin,Cout), b_ref (1,Cout), o_ref (1,TL,Cout)
    refs (KH == 0): same without halo_ref.
    """
    if KH > 0:
        x_ref, halo_ref, w_ref, b_ref, o_ref = refs
    else:
        x_ref, w_ref, b_ref, o_ref = refs
        halo_ref = None

    t = pl.program_id(1)
    Cout = o_ref.shape[-1]

    main = x_ref[0]                                          # (TL, Cin)
    row = lax.broadcasted_iota(jnp.int32, (TL, 1), 0)

    if ragged:
        # Zero the unspecified rows Pallas pads into the ragged edge block so
        # they cannot leak into valid outputs through the pad_r taps.
        valid = L - t * TL
        main = jnp.where(row < valid, main, jnp.zeros_like(main))

    if KH > 0:
        if halo_resident:
            halo = halo_ref[0, pl.ds(t, 1), :, :][0]          # (KH, Cin)
        else:
            halo = halo_ref[0, 0, :, :]                       # (KH, Cin)

    acc = jnp.zeros((TL, Cout), jnp.float32)
    for k in range(K):
        d = k - pad_l                       # input offset of tap k vs output row
        if d == 0:
            lhs = main
        else:
            lhs = pltpu.roll(main, shift=(-d) % TL, axis=0)
            if d < 0:                       # first |d| rows come from left halo
                for i in range(-d):
                    h = halo[pad_l + d + i:pad_l + d + i + 1, :]   # (1, Cin)
                    lhs = jnp.where(row == i, h, lhs)
            else:                           # last d rows come from right halo
                for i in range(d):
                    h = halo[pad_l + i:pad_l + i + 1, :]           # (1, Cin)
                    lhs = jnp.where(row == TL - d + i, h, lhs)
        acc += jnp.dot(lhs, w_ref[k], preferred_element_type=jnp.float32)

    acc += b_ref[...].astype(jnp.float32)                    # (1, Cout) broadcasts
    o_ref[0, :, :] = acc.astype(o_ref.dtype)


def conv_forward(x, weight, bias, *, kernel_size, pad_type, seq_tile=1024,
                 max_resident_halo_bytes=2 * 1024 * 1024):
    """Equivalent of Conv.forward.

    x      : [B, L, Cin]     (same layout the PyTorch module takes)
    weight : [Cout, Cin, K]  (torch.nn.Conv1d weight layout)
    bias   : [Cout]
    returns: [B, L, Cout]    (dtype follows x; pass bf16 for bf16 end-to-end)
    """
    B, L, Cin = x.shape
    Cout, Cin_w, K = weight.shape
    assert Cin_w == Cin and K == kernel_size

    if pad_type == "left":
        pad_l, pad_r = K - 1, 0
    elif pad_type == "both":
        pad_l, pad_r = K // 2, (K - 1) // 2
    else:
        raise ValueError(f"unknown pad_type: {pad_type!r}")
    KH = pad_l + pad_r                                       # == K - 1

    # ---- sequence tiling (large tiles; v5e ~512, v6e/v7x 1024-2048) --------
    TL = max(8, min(_round_up(int(seq_tile), 8), _round_up(L, 8)))
    T = (L + TL - 1) // TL
    if B * T < 2 and L > 8:        # keep >=2 grid steps for v7x megacore
        TL = max(8, _round_up((L + 1) // 2, 8))
        T = (L + TL - 1) // TL
    ragged = (L % TL) != 0
    assert TL >= max(pad_l, pad_r, 1), "sequence tile smaller than conv halo"

    # ---- lane-dense output channels -----------------------------------------
    Cout_p = _round_up(Cout, 128)
    if Cout_p != Cout:
        weight = jnp.pad(weight, ((0, Cout_p - Cout), (0, 0), (0, 0)))
        bias = jnp.pad(bias, (0, Cout_p - Cout))

    # operands follow x's dtype; accumulation stays f32 in-kernel
    w = jnp.transpose(weight, (2, 1, 0)).astype(x.dtype)     # (K, Cin, Cout_p)
    b2 = bias.reshape(1, Cout_p).astype(jnp.float32)

    args = [x]
    in_specs = [pl.BlockSpec((1, TL, Cin), lambda b, t: (b, t, 0))]

    # ---- halo sidecar: the K-1 rows each tile needs from outside its block --
    halo_resident = False
    if KH > 0:
        starts = jnp.arange(T, dtype=jnp.int32) * TL
        parts = []
        if pad_l > 0:
            parts.append(starts[:, None] - pad_l
                         + jnp.arange(pad_l, dtype=jnp.int32)[None, :])
        if pad_r > 0:
            parts.append(starts[:, None] + TL
                         + jnp.arange(pad_r, dtype=jnp.int32)[None, :])
        idx = jnp.concatenate(parts, axis=1) if len(parts) > 1 else parts[0]
        in_range = (idx >= 0) & (idx < L)                     # (T, KH)
        halo = jnp.take(x, jnp.clip(idx, 0, L - 1).reshape(-1), axis=1)
        halo = halo.reshape(B, T, KH, Cin)
        halo = halo * in_range.astype(x.dtype)[None, :, :, None]   # zero pad rows
        args.append(halo)

        halo_bytes = T * KH * Cin * halo.dtype.itemsize
        halo_resident = halo_bytes <= max_resident_halo_bytes
        if halo_resident:
            # whole per-batch-row halo stays in VMEM: one DMA per batch row
            in_specs.append(pl.BlockSpec((1, T, KH, Cin), lambda b, t: (b, 0, 0, 0)))
        else:
            # fallback for very long sequences: tiny per-step halo block
            in_specs.append(pl.BlockSpec((1, 1, KH, Cin), lambda b, t: (b, t, 0, 0)))

    in_specs += [
        pl.BlockSpec((K, Cin, Cout_p), lambda b, t: (0, 0, 0)),   # resident weights
        pl.BlockSpec((1, Cout_p), lambda b, t: (0, 0)),           # resident bias
    ]
    args += [w, b2]

    kernel = functools.partial(
        _conv1d_kernel, K=K, pad_l=pad_l, pad_r=pad_r, KH=KH, TL=TL, L=L,
        ragged=ragged, halo_resident=halo_resident)

    out = pl.pallas_call(
        kernel,
        out_shape=jax.ShapeDtypeStruct((B, L, Cout_p), x.dtype),
        grid_spec=pltpu.PrefetchScalarGridSpec(
            num_scalar_prefetch=0,
            grid=(B, T),
            in_specs=in_specs,
            out_specs=pl.BlockSpec((1, TL, Cout_p), lambda b, t: (b, t, 0)),
        ),
        compiler_params=pltpu.CompilerParams(
            dimension_semantics=("parallel", "parallel")),
    )(*args)

    if Cout_p != Cout:
        out = out[:, :, :Cout]
    return out


def conv_reference(x, weight, bias, *, kernel_size, pad_type):
    """Pure-JAX reference matching torch.nn.Conv1d semantics."""
    if pad_type == "left":
        pad_l, pad_r = kernel_size - 1, 0
    else:
        pad_l, pad_r = kernel_size // 2, (kernel_size - 1) // 2
    x_ncw = jnp.transpose(x, (0, 2, 1))  # [B, Cin, L]
    y = jax.lax.conv_general_dilated(
        x_ncw, weight, window_strides=(1,), padding=[(pad_l, pad_r)],
        dimension_numbers=("NCH", "OIH", "NCH"))
    y = y + bias[None, :, None]
    return jnp.transpose(y, (0, 2, 1))   # [B, L, Cout]


if __name__ == "__main__":
    B, Cin, Cout, K = 2, 64, 128, 3
    key = jax.random.PRNGKey(0)
    kx, kw, kb, kw1, kb1, kw2, kb2 = jax.random.split(key, 7)

    bound = 1.0 / (Cin * K) ** 0.5
    weight = jax.random.uniform(kw, (Cout, Cin, K), jnp.float32, -bound, bound)
    bias = jax.random.uniform(kb, (Cout,), jnp.float32, -bound, bound)

    def check(out, ref, atol, rtol, tag):
        assert out.shape == ref.shape, tag
        assert jnp.allclose(out.astype(jnp.float32), ref, atol=atol, rtol=rtol), (
            f"mismatch vs reference: {tag}")

    # f32 configs; seq_tile=128 keeps several tiles at demo sizes so the
    # cross-tile halo and ragged edge-block paths are exercised.
    for pad_type, L in [("left", 384), ("both", 384), ("left", 200), ("both", 200)]:
        x = jax.random.normal(kx, (B, L, Cin), dtype=jnp.float32)
        out = jax.block_until_ready(conv_forward(
            x, weight, bias, kernel_size=K, pad_type=pad_type, seq_tile=128))
        ref = conv_reference(x, weight, bias, kernel_size=K, pad_type=pad_type)
        check(out, ref, 1e-3, 1e-3, f"f32 {pad_type} L={L}")

    # forced per-step halo block path (normally used only for very long L)
    x = jax.random.normal(kx, (B, 384, Cin), dtype=jnp.float32)
    out = jax.block_until_ready(conv_forward(
        x, weight, bias, kernel_size=K, pad_type="both", seq_tile=128,
        max_resident_halo_bytes=0))
    ref = conv_reference(x, weight, bias, kernel_size=K, pad_type="both")
    check(out, ref, 1e-3, 1e-3, "per-step halo")

    # K == 1: no halo input at all
    b1d = 1.0 / Cin ** 0.5
    w1 = jax.random.uniform(kw1, (Cout, Cin, 1), jnp.float32, -b1d, b1d)
    b1 = jax.random.uniform(kb1, (Cout,), jnp.float32, -b1d, b1d)
    x = jax.random.normal(kx, (B, 256, Cin), dtype=jnp.float32)
    out = jax.block_until_ready(conv_forward(
        x, w1, b1, kernel_size=1, pad_type="both", seq_tile=128))
    ref = conv_reference(x, w1, b1, kernel_size=1, pad_type="both")
    check(out, ref, 1e-3, 1e-3, "K=1")

    # Cout not a multiple of 128 -> wrapper pads channels for lane-dense stores
    w2 = jax.random.uniform(kw2, (96, Cin, K), jnp.float32, -bound, bound)
    b2 = jax.random.uniform(kb2, (96,), jnp.float32, -bound, bound)
    out = jax.block_until_ready(conv_forward(
        x, w2, b2, kernel_size=K, pad_type="both", seq_tile=128))
    ref = conv_reference(x, w2, b2, kernel_size=K, pad_type="both")
    check(out, ref, 1e-3, 1e-3, "Cout=96")

    # end-to-end bf16 (halves HBM traffic); compare vs f32 ref of rounded inputs
    x_bf = x.astype(jnp.bfloat16)
    w_bf = weight.astype(jnp.bfloat16)
    out = jax.block_until_ready(conv_forward(
        x_bf, w_bf, bias, kernel_size=K, pad_type="both", seq_tile=128))
    ref = conv_reference(x_bf.astype(jnp.float32), w_bf.astype(jnp.float32),
                         bias, kernel_size=K, pad_type="both")
    check(out, ref, 3e-2, 3e-2, "bf16")

    print("KERNEL_OK")
</pallas_src>

<mosaic_0001>
module attributes {stable_mosaic.version = 11 : i64} {
  func.func @_conv1d_kernel(%arg0: i32, %arg1: i32, %arg2: memref<1x128x64xf32, #tpu.memory_space<vmem>>, %arg3: memref<1x3x2x64xf32, #tpu.memory_space<vmem>>, %arg4: memref<3x64x128xf32, #tpu.memory_space<vmem>>, %arg5: memref<1x128xf32, #tpu.memory_space<vmem>>, %arg6: memref<1x128x128xf32, #tpu.memory_space<vmem>>) attributes {dimension_semantics = [#tpu.dimension_semantics<parallel>, #tpu.dimension_semantics<parallel>], iteration_bounds = array<i64: 2, 3>, scalar_prefetch = 0 : i64, scratch_operands = 0 : i64, tpu.core_type = #tpu.core_type<tc>, window_params = [{transform_indices = @transform_0, window_bounds = array<i64: 1, 128, 64>}, {transform_indices = @transform_1, window_bounds = array<i64: 1, 3, 2, 64>}, {pipeline_mode = #tpu.pipeline_mode<synchronous>, transform_indices = @transform_2, window_bounds = array<i64: 3, 64, 128>}, {pipeline_mode = #tpu.pipeline_mode<synchronous>, transform_indices = @transform_3, window_bounds = array<i64: 1, 128>}, {transform_indices = @transform_4, window_bounds = array<i64: 1, 128, 128>}]} {
    %c0 = arith.constant 0 : index
    %c0_0 = arith.constant 0 : index
    %c0_1 = arith.constant 0 : index
    %0 = vector.load %arg2[%c0, %c0_0, %c0_1] : memref<1x128x64xf32, #tpu.memory_space<vmem>>, vector<1x128x64xf32>
    %1 = vector.shape_cast %0 : vector<1x128x64xf32> to vector<128x64xf32>
    %2 = tpu.iota {dimensions = array<i32: 0>} : vector<128x1xi32>
    %c0_2 = arith.constant 0 : index
    %3 = arith.index_cast %arg1 : i32 to index
    %c0_3 = arith.constant 0 : index
    %c0_4 = arith.constant 0 : index
    %4 = vector.load %arg3[%c0_2, %3, %c0_3, %c0_4] : memref<1x3x2x64xf32, #tpu.memory_space<vmem>>, vector<1x1x2x64xf32>
    %5 = vector.shape_cast %4 : vector<1x1x2x64xf32> to vector<1x2x64xf32>
    %6 = vector.shape_cast %5 : vector<1x2x64xf32> to vector<2x64xf32>
    %cst = arith.constant 0.000000e+00 : f32
    %7 = vector.broadcast %cst : f32 to vector<128x128xf32>
    %c2_i32 = arith.constant 2 : i32
    %8 = tpu.dynamic_rotate %1 by %c2_i32 dim 0 : vector<128x64xf32>, i32 -> vector<128x64xf32>
    %9 = vector.extract_strided_slice %6 {offsets = [0, 0], sizes = [1, 64], strides = [1, 1]} : vector<2x64xf32> to vector<1x64xf32>
    %c0_i32 = arith.constant 0 : i32
    %10 = vector.broadcast %c0_i32 : i32 to vector<128x1xi32>
    %11 = arith.cmpi eq, %2, %10 : vector<128x1xi32>
    %12 = vector.shape_cast %11 : vector<128x1xi1> to vector<128x1xi1>
    %13 = vector.broadcast %12 : vector<128x1xi1> to vector<128x64xi1>
    %14 = vector.shape_cast %9 : vector<1x64xf32> to vector<1x64xf32>
    %15 = vector.broadcast %14 : vector<1x64xf32> to vector<128x64xf32>
    %16 = arith.select %13, %15, %8 : vector<128x64xi1>, vector<128x64xf32>
    %17 = vector.extract_strided_slice %6 {offsets = [1, 0], sizes = [1, 64], strides = [1, 1]} : vector<2x64xf32> to vector<1x64xf32>
    %c1_i32 = arith.constant 1 : i32
    %18 = vector.broadcast %c1_i32 : i32 to vector<128x1xi32>
    %19 = arith.cmpi eq, %2, %18 : vector<128x1xi32>
    %20 = vector.shape_cast %19 : vector<128x1xi1> to vector<128x1xi1>
    %21 = vector.broadcast %20 : vector<128x1xi1> to vector<128x64xi1>
    %22 = vector.shape_cast %17 : vector<1x64xf32> to vector<1x64xf32>
    %23 = vector.broadcast %22 : vector<1x64xf32> to vector<128x64xf32>
    %24 = arith.select %21, %23, %16 : vector<128x64xi1>, vector<128x64xf32>
    %c0_5 = arith.constant 0 : index
    %c0_6 = arith.constant 0 : index
    %c0_7 = arith.constant 0 : index
    %25 = vector.load %arg4[%c0_5, %c0_6, %c0_7] : memref<3x64x128xf32, #tpu.memory_space<vmem>>, vector<1x64x128xf32>
    %26 = vector.shape_cast %25 : vector<1x64x128xf32> to vector<64x128xf32>
    %cst_8 = arith.constant dense<0.000000e+00> : vector<128x128xf32>
    %27 = tpu.matmul %24, %26, %cst_8 {dimension_numbers = #tpu.dot_dimension_numbers<[1], [0], [0], [1], [0, 0, 1, 1], [], []>} : vector<128x64xf32>, vector<64x128xf32>, vector<128x128xf32> -> vector<128x128xf32>
    %28 = arith.addf %7, %27 : vector<128x128xf32>
    %c1_i32_9 = arith.constant 1 : i32
    %29 = tpu.dynamic_rotate %1 by %c1_i32_9 dim 0 : vector<128x64xf32>, i32 -> vector<128x64xf32>
    %30 = vector.extract_strided_slice %6 {offsets = [1, 0], sizes = [1, 64], strides = [1, 1]} : vector<2x64xf32> to vector<1x64xf32>
    %c0_i32_10 = arith.constant 0 : i32
    %31 = vector.broadcast %c0_i32_10 : i32 to vector<128x1xi32>
    %32 = arith.cmpi eq, %2, %31 : vector<128x1xi32>
    %33 = vector.shape_cast %32 : vector<128x1xi1> to vector<128x1xi1>
    %34 = vector.broadcast %33 : vector<128x1xi1> to vector<128x64xi1>
    %35 = vector.shape_cast %30 : vector<1x64xf32> to vector<1x64xf32>
    %36 = vector.broadcast %35 : vector<1x64xf32> to vector<128x64xf32>
    %37 = arith.select %34, %36, %29 : vector<128x64xi1>, vector<128x64xf32>
    %c1 = arith.constant 1 : index
    %c0_11 = arith.constant 0 : index
    %c0_12 = arith.constant 0 : index
    %38 = vector.load %arg4[%c1, %c0_11, %c0_12] : memref<3x64x128xf32, #tpu.memory_space<vmem>>, vector<1x64x128xf32>
    %39 = vector.shape_cast %38 : vector<1x64x128xf32> to vector<64x128xf32>
    %cst_13 = arith.constant dense<0.000000e+00> : vector<128x128xf32>
    %40 = tpu.matmul %37, %39, %cst_13 {dimension_numbers = #tpu.dot_dimension_numbers<[1], [0], [0], [1], [0, 0, 1, 1], [], []>} : vector<128x64xf32>, vector<64x128xf32>, vector<128x128xf32> -> vector<128x128xf32>
    %41 = arith.addf %28, %40 : vector<128x128xf32>
    %c2 = arith.constant 2 : index
    %c0_14 = arith.constant 0 : index
    %c0_15 = arith.constant 0 : index
    %42 = vector.load %arg4[%c2, %c0_14, %c0_15] : memref<3x64x128xf32, #tpu.memory_space<vmem>>, vector<1x64x128xf32>
    %43 = vector.shape_cast %42 : vector<1x64x128xf32> to vector<64x128xf32>
    %cst_16 = arith.constant dense<0.000000e+00> : vector<128x128xf32>
    %44 = tpu.matmul %1, %43, %cst_16 {dimension_numbers = #tpu.dot_dimension_numbers<[1], [0], [0], [1], [0, 0, 1, 1], [], []>} : vector<128x64xf32>, vector<64x128xf32>, vector<128x128xf32> -> vector<128x128xf32>
    %45 = arith.addf %41, %44 : vector<128x128xf32>
    %c0_17 = arith.constant 0 : index
    %c0_18 = arith.constant 0 : index
    %46 = vector.load %arg5[%c0_17, %c0_18] : memref<1x128xf32, #tpu.memory_space<vmem>>, vector<1x128xf32>
    %47 = vector.broadcast %46 : vector<1x128xf32> to vector<128x128xf32>
    %48 = arith.addf %45, %47 : vector<128x128xf32>
    %c0_19 = arith.constant 0 : index
    %c0_20 = arith.constant 0 : index
    %c0_21 = arith.constant 0 : index
    %49 = vector.load %arg6[%c0_19, %c0_20, %c0_21] : memref<1x128x128xf32, #tpu.memory_space<vmem>>, vector<1x128x128xf32>
    %50 = vector.shape_cast %49 : vector<1x128x128xf32> to vector<128x128xf32>
    %51 = vector.shape_cast %48 : vector<128x128xf32> to vector<1x128x128xf32>
    tpu.vector_store %arg6[%c0_19, %c0_20, %c0_21], %51 {strides = array<i32>} : memref<1x128x128xf32, #tpu.memory_space<vmem>>, vector<1x128x128xf32>,
    return
  }
  func.func @transform_0(%arg0: i32, %arg1: i32) -> (i32, i32, i32) {
    %c0_i32 = arith.constant 0 : i32
    %c0_i32_0 = arith.constant 0 : i32
    return %arg0, %arg1, %c0_i32 : i32, i32, i32
  }
  func.func @transform_1(%arg0: i32, %arg1: i32) -> (i32, i32, i32, i32) {
    %c0_i32 = arith.constant 0 : i32
    %c0_i32_0 = arith.constant 0 : i32
    %c0_i32_1 = arith.constant 0 : i32
    %c0_i32_2 = arith.constant 0 : i32
    return %arg0, %c0_i32, %c0_i32_0, %c0_i32_1 : i32, i32, i32, i32
  }
  func.func @transform_2(%arg0: i32, %arg1: i32) -> (i32, i32, i32) {
    %c0_i32 = arith.constant 0 : i32
    %c0_i32_0 = arith.constant 0 : i32
    %c0_i32_1 = arith.constant 0 : i32
    %c0_i32_2 = arith.constant 0 : i32
    return %c0_i32, %c0_i32_0, %c0_i32_1 : i32, i32, i32
  }
  func.func @transform_3(%arg0: i32, %arg1: i32) -> (i32, i32) {
    %c0_i32 = arith.constant 0 : i32
    %c0_i32_0 = arith.constant 0 : i32
    %c0_i32_1 = arith.constant 0 : i32
    return %c0_i32, %c0_i32_0 : i32, i32
  }
  func.func @transform_4(%arg0: i32, %arg1: i32) -> (i32, i32, i32) {
    %c0_i32 = arith.constant 0 : i32
    %c0_i32_0 = arith.constant 0 : i32
    return %arg0, %arg1, %c0_i32 : i32, i32, i32
  }
}

</mosaic_0001>

<bundles_post_ra>
// kernel: tpu_custom_call.1
= control target key start
LH: loop header
LB: loop body
LE: loop exit
PB: predicated region body
PF: predicated region fallthrough
CT: control target
= control target key end

     0   :  { %9 = vsyncpa [#allocation3], 0  ;;  %s1833_s0 = inlined_call_operand.vmem [shape: f32[2,384,64], index: 0, kind: input, shape index: {}]   ;;  %s1834_s1 = inlined_call_operand.vmem [shape: f32[2,3,2,64], index: 1, kind: input, shape index: {}]   ;;  %s1835_s2 = inlined_call_operand.vmem [shape: f32[3,64,128], index: 2, kind: input, shape index: {}]   ;;  %s1836_s3 = inlined_call_operand.vmem [shape: f32[1,128], index: 3, kind: input, shape index: {}]   ;;  %s1837_s4 = inlined_call_operand.hbm [shape: f32[2,384,128], index: 4, kind: output, shape index: {}]  }
   0x1   :  { %11 = vsyncpa [#allocation3 + $0x1], 0  ;;  %s1330_s15 = smov 0   ;;  %s1332_s16 = smov 0  }
   0x2   :  { %s1334_s17 = smov 0   ;;  %s1336_s18 = smov 0  }
   0x3   :  { %s1338_s19 = smov 0   ;;  %s1340_s20 = smov 0  }
   0x4   :  { %s1342_s21 = smov 0   ;;  %s1344_s22 = smov 0  }
   0x5 LB: > { %s1027_s23 = sadd.s32 4294967295, %s1301_s22   ;;  %s1028_s24 = sadd.s32 4294967294, %s1301_s22   ;;  %s1301_s22 = sphi %s1344_s22, %s17_s22   ;;  %s1297_s21 = sphi %s1342_s21, %s1846_s21   ;;  %s1293_s20 = sphi %s1340_s20, %s1845_s20   ;;  %s1289_s19 = sphi %s1338_s19, %s1844_s19   ;;  %s1285_s18 = sphi %s1336_s18, %s1843_s18   ;;  %s1281_s17 = sphi %s1334_s17, %s1842_s17   ;;  %s1277_s16 = sphi %s1332_s16, %s1841_s16   ;;  %s1273_s15 = sphi %s1330_s15, %s1840_s15  }
   0x6   : > { %s26_s25 = sadd.s32 1, %s1293_s20  ;;  %s29_s26 = sadd.s32 1, %s1297_s21 }
   0x7   : > { %p27_p0 = scmp.ge.s32.totalorder %s26_s25, 3  ;;  %p144_p1 = scmp.ne.s32.totalorder %s1281_s17, %s1277_s16 }
   0x8   : > { %p145_p2 = scmp.eq.s32.totalorder %s1027_s23, 5  ;;  %p150_p5 = scmp.ne.s32.totalorder %s1277_s16, %s1273_s15 }
   0x9   : > { %s1848_s25 = smov (%p27_p0, %s26_s25), 0  ;;  %s1850_s26 = smov (!%p27_p0, %s29_s26), %s1297_s21 }
   0xa   : > { %s130_s27 = ssub.s32 %s1293_s20, %s1848_s25  ;;  %p1381_p3 = por %p145_p2, %p144_p1 }
   0xb   : > { %p31_p4 = scmp.ge.s32.totalorder %s1850_s26, 2  ;;  %p151_p6 = scmp.eq.s32.totalorder %s1028_s24, 5 }
   0xc   : > { %p1031_p7 = scmp.ge.s32.totalorder %s1301_s22, 1  ;;  %p196_p9 = scmp.lt.s32.totalorder %s1301_s22, 7 }
   0xd   : > { %s1852_s26 = smov (%p31_p4, %s1850_s26), 0  ;;  %p1390_p8 = por %p151_p6, %p150_p5 }
   0xe   : > { %s129_s30 = ssub.s32 %s1297_s21, %s1852_s26  ;;  %s134_s5 = sadd.s32 1, %s1281_s17 }
   0xf   : > { %s131_s6 = sor.u32 %s130_s27, %s129_s30  ;;  %p197_p10 = pnand %p1031_p7, %p196_p9 }
  0x10   : > { %p132_p11 = scmp.eq.s32.totalorder %s131_s6, 0  ;;  %s1413_s14 = sshll.u32 (!%p197_p10), %s1285_s18, 4 }
  0x11   : > { %200 = sbr.rel (%p197_p10) target bundleno = 267 (0x10b), region = 36  ;;  %p232_p12 = scmp.lt.s32.totalorder (!%p197_p10), %s1289_s19, 1 }
  0x12   : > { %s1399_s7 = scalar_select %p132_p11, %s1281_s17, %s134_s5  }
  0x13   : > { %p234_p13 = scmp.lt.s32.totalorder (!%p197_p10), %s1413_s14, 47 }
  0x16   : > { %v1044_v0 = vld [vmem:[%s1835_s2 + $0x78] sm:$0xff]  ;;  %v1043_v2 = vld [vmem:[%s1835_s2 + $0x70] sm:$0xff]  ;;  %v263_v5 = vlaneseq  ;;  %v1042_v6 = vld [vmem:[%s1835_s2 + $0x68] sm:$0xff]  ;;  %s1443_s12 = scalar_select %p232_p12, %s1289_s19, 1  ;;  %vm512_vm3 = vcmask 523264  }
  0x17   : > { %v1407_v1 = vld [vmem:[%s1835_s2 + $0xb8] sm:$0xff]  ;;  %1106 = vmatpush.msra.mxu3 %v1044_v0  ;;  %v1420_v3 = vld [vmem:[%s1835_s2 + $0xb0] sm:$0xff]  ;;  %569 = vmatpush.msra.mxu0 %v1044_v0  ;;  %v1435_v7 = vld [vmem:[%s1835_s2 + $0xa8] sm:$0xff]  ;;  %s235_s24 = scalar_select %p234_p13, %s1413_s14, 47 }
  0x18   : > { %804 = vmatpush.msra.mxu2 %v1407_v1  ;;  %v1425_v4 = vld [vmem:[%s1835_s2 + $0x38] sm:$0xff]  ;;  %v1440_v8 = vld [vmem:[%s1835_s2 + $0x30] sm:$0xff]  ;;  %v1449_v9 = vld [vmem:[%s1835_s2 + $0x28] sm:$0xff]  ;;  %s1130_s8 = smul.u32 48, %s1443_s12  ;;  %v1468_v13 = vshrl.u32 %v263_v5, 7 }
  0x19   : > { %682 = vmatpush.msra.mxu1 %v1425_v4  ;;  %1107 = vmatpush.msra.mxu3 %v1043_v2  ;;  %v1041_v10 = vld [vmem:[%s1835_s2 + $0x60] sm:$0xff]  ;;  %s1131_s11 = smul.u32 6, %s1443_s12  ;;  %v1040_v14 = vld [vmem:[%s1835_s2 + $0x58] sm:$0xff]  ;;  %v1039_v16 = vld [vmem:[%s1835_s2 + $0x50] sm:$0xff] }
  0x1a   : > { %805 = vmatpush.msra.mxu2 %v1420_v3  ;;  %570 = vmatpush.msra.mxu0 %v1043_v2  ;;  %v1459_v11 = vld [vmem:[%s1835_s2 + $0xa0] sm:$0xff]  ;;  %v1478_v15 = vld [vmem:[%s1835_s2 + $0x98] sm:$0xff]  ;;  %s237_s5 = sadd.s32 %s1130_s8, %s235_s24  ;;  %v1487_v17 = vld [vmem:[%s1835_s2 + $0x90] sm:$0xff]  ;;  %vm470_vm0 = vcmp.lt.s32.totalorder %v1468_v13, 1  ;;  %vm299_vm1 = vcmp.lt.s32.totalorder %v1468_v13, 2  ;;  %vm316_vm2 = vcmp.eq.s32.totalorder %v1468_v13, 0 }
  0x1b   : > { %683 = vmatpush.msra.mxu1 %v1440_v8  ;;  %1108 = vmatpush.msra.mxu3 %v1042_v6  ;;  %v1466_v12 = vld [vmem:[%s1835_s2 + $0x20] sm:$0xff]  ;;  %v1492_v18 = vld [vmem:[%s1835_s2 + $0x18] sm:$0xff]  ;;  %s1034_s27 = sshll.u32 %s237_s5, 3  ;;  %v1038_v19 = vld [vmem:[%s1835_s2 + $0x48] sm:$0xff]  ;;  %s245_s23 = scalar_lea.vmem %s1834_s1, %s1131_s11  ;;  %vm381_vm4 = vcmp.eq.s32.totalorder %v1468_v13, 1 }
  0x1c   : > { %806 = vmatpush.msra.mxu2 %v1435_v7  ;;  %571 = vmatpush.msra.mxu0 %v1042_v6  ;;  %v1501_v20 = vld [vmem:[%s1835_s2 + $0x10] sm:$0xff]  ;;  %s1506_s10 = scalar_lea.vmem %s1833_s0, %s1034_s27  ;;  %s1036_s27 = sshll.u32 %s1285_s18, 1  ;;  %v1528_v24 = vld [vmem:[%s1835_s2 + $0x88] sm:$0xff]  ;;  %v1037_v34 = vld [vmem:[%s1835_s2 + $0x40] sm:$0xff] }
  0x1d   : > { %684 = vmatpush.msra.mxu1 %v1449_v9  ;;  %1109 = vmatpush.msra.mxu3 %v1041_v10  ;;  %v1510_v21 = vld [vmem:[%s1506_s10 + $0x58] sm:$0xff]  ;;  %v1513_v22 = vld [vmem:[%s1506_s10 + $0x60] sm:$0xff]  ;;  %s281_s18 = scalar_lea.vmem %s245_s23, %s1036_s27  ;;  %v447_v30 = vld [vmem:[%s1835_s2 + $0x8] sm:$0xff]  ;;  %s1132_s11 = smul.u32 48, %s1289_s19 }
  0x1e   : > { %807 = vmatpush.msra.mxu2 %v1459_v11  ;;  %572 = vmatpush.msra.mxu0 %v1041_v10  ;;  %v1517_v23 = vld [vmem:[%s1506_s10] sm:$0xff]  ;;  %v465_v25 = vrot.slane %v1510_v21, 7  ;;  %v466_v26 = vrot.slane %v1513_v22, 7  ;;  %v1535_v29 = vld [vmem:[%s1506_s10 + $0x78] sm:$0xff]  ;;  %v1570_v42 = vld [vmem:[%s1506_s10 + $0x68] sm:$0xff]  ;;  %v295_v5 = vrot.slane %v1513_v22, 6 }
  0x1f   : > { %685 = vmatpush.msra.mxu1 %v1466_v12  ;;  %1110 = vmatpush.msra.mxu3 %v1040_v14  ;;  %v283_v27 = vrot.slane %v1517_v23, 6  ;;  %v454_v28 = vrot.slane %v1517_v23, 7  ;;  %v282_v31 = vld [vmem:[%s281_s18] sm:$0x3]  ;;  %v469_v32 = vrot.slane %v1535_v29, 7  ;;  %v298_v33 = vrot.slane %v1535_v29, 6  ;;  %s925_s30 = sadd.s32 %s1132_s11, %s1413_s14 }
  0x20   : > { %808 = vmatpush.msra.mxu2 %v1478_v15  ;;  %573 = vmatpush.msra.mxu0 %v1040_v14  ;;  %v1551_v35 = vld [vmem:[%s1835_s2 + $0x80] sm:$0xff]  ;;  %v364_v36 = vperm.slane %v282_v31, 0  ;;  %v429_v37 = vperm.slane %v282_v31, 1  ;;  %v474_v38 = vsel %vm470_vm0, %v465_v25, %v466_v26  ;;  %v248_v46 = vld [vmem:[%s1506_s10 + $0x8] sm:$0xff]  ;;  %v467_v47 = vrot.slane %v1570_v42, 7  ;;  %v1591_v51 = vld [vmem:[%s1506_s10 + $0x70] sm:$0xff] }
  0x21   : > { %686 = vmatpush.msra.mxu1 %v1492_v18  ;;  %1111 = vmatpush.msra.mxu3 %v1039_v16  ;;  %v486_v39 = vsel %vm470_vm0, %v469_v32, %v454_v28  ;;  %v315_v40 = vsel %vm299_vm1, %v298_v33, %v283_v27  ;;  %v446_v43 = vld [vmem:[%s1835_s2] sm:$0xff]  ;;  %v455_v48 = vrot.slane %v248_v46, 7  ;;  %v284_v49 = vrot.slane %v248_v46, 6  ;;  %v249_v54 = vld [vmem:[%s1506_s10 + $0x10] sm:$0xff]  ;;  %v250_v61 = vld [vmem:[%s1506_s10 + $0x18] sm:$0xff]  ;;  %s1103_s6 = sshll.u32 %s925_s30, 3 }
  0x22   : > { %809 = vmatpush.msra.mxu2 %v1487_v17  ;;  %574 = vmatpush.msra.mxu0 %v1039_v16  ;;  %v365_v41 = vsel %vm316_vm2, %v364_v36, %v315_v40  ;;  %v487_v44 = vsel %vm316_vm2, %v429_v37, %v486_v39  ;;  %v473_v50 = vsel %vm470_vm0, %v466_v26, %v467_v47  ;;  %v468_v55 = vrot.slane %v1591_v51, 7  ;;  %v256_v26 = vld [vmem:[%s1506_s10 + $0x48] sm:$0xff]  ;;  %v257_v40 = vld [vmem:[%s1506_s10 + $0x50] sm:$0xff]  ;;  %s927_s12 = scalar_lea.hbm %s1837_s4, %s1103_s6  ;;  %s1227_s11 = scalar_lea.hbm %s1837_s4, 768 }
  0x23   : > { %687 = vmatpush.msra.mxu1 %v1501_v20  ;;  %1112 = vmatpush.msra.mxu3 %v1038_v19  ;;  %v430_v45 = vsel %vm381_vm4, %v429_v37, %v365_v41  ;;  %v485_v52 = vsel %vm470_vm0, %v454_v28, %v455_v48  ;;  %v314_v53 = vsel %vm299_vm1, %v283_v27, %v284_v49  ;;  %v456_v56 = vrot.slane %v249_v54, 7  ;;  %s930_s14 = sshll.u32 %s927_s12, 4  ;;  %s931_s14 = int_to_ptr.hbm [resolvable:$true] %s930_s14 }
  0x24   : > { %810 = vmatpush.msra.mxu2 %v1528_v24  ;;  %575 = vmatpush.msra.mxu0 %v1038_v19  ;;  %v285_v57 = vrot.slane %v249_v54, 6  ;;  %v472_v58 = vsel %vm470_vm0, %v467_v47, %v468_v55  ;;  %v457_v62 = vrot.slane %v250_v61, 7  ;;  %v286_v63 = vrot.slane %v250_v61, 6  ;;  %s1221_s23 = sshra.s32 %s931_s14, 4  ;;  %s1222_s23 = int_to_ptr.hbm [resolvable:$true] %s1221_s23 }
  0x25   : > { %688 = vmatpush.msra.mxu1 %v447_v30  ;;  %1113 = vmatpush.msra.mxu3 %v1037_v34  ;;  %v484_v59 = vsel %vm470_vm0, %v455_v48, %v456_v56  ;;  %v471_v0 = vsel %vm470_vm0, %v468_v55, %v469_v32  ;;  %v463_v28 = vrot.slane %v256_v26, 7  ;;  %v292_v31 = vrot.slane %v256_v26, 6  ;;  %p1228_p4 = scmp.lt.s32.totalorder %s1222_s23, %s1837_s4 }
  0x26   : > { %811 = vmatpush.msra.mxu2 %v1551_v35  ;;  %1057 = vmatmul.msk.f32.vlgmr.msra.gmra.mxu3 %vm512_vm3, %v474_v38  ;;  %v313_v60 = vsel %vm299_vm1, %v284_v49, %v285_v57  ;;  %v312_v2 = vsel %vm299_vm1, %v285_v57, %v286_v63  ;;  %v297_v37 = vrot.slane %v1591_v51, 6 }
  0x27   : > { %1085 = vmatmul.msk.f32.vlgmr.msra.gmra.mxu2 %vm512_vm3, %v1517_v23  ;;  %1114 = vmatpush.msrb.mxu3 %v1425_v4  ;;  %v294_v4 = vrot.slane %v1510_v21, 6 }
  0x28   : > { %576 = vmatpush.msra.mxu0 %v1037_v34  ;;  %689 = vmatpush.msra.mxu1 %v446_v43 }
  0x29   : > { %1045 = vmatmul.msk.f32.vlgmr.msra.gmra.mxu0 %vm512_vm3, %v487_v44  ;;  %1115 = vmatpush.msrb.mxu3 %v1440_v8  ;;  %v255_v8 = vld [vmem:[%s1506_s10 + $0x40] sm:$0xff] }
  0x2a   : > { %1061 = vmatmul.msk.f32.vlgmr.msra.gmra.mxu1 %vm512_vm3, %v430_v45  ;;  %v462_v10 = vrot.slane %v255_v8, 7  ;;  %v291_v14 = vrot.slane %v255_v8, 6  ;;  %v293_v45 = vrot.slane %v257_v40, 6 }
  0x2b   : > { %1116 = vmatpush.msrb.mxu3 %v1449_v9 }
  0x2c   : > { %v477_v36 = vsel %vm470_vm0, %v462_v10, %v463_v28  ;;  %v306_v38 = vsel %vm299_vm1, %v291_v14, %v292_v31  ;;  %v305_v49 = vsel %vm299_vm1, %v292_v31, %v293_v45 }
  0x2d   : > { %1117 = vmatpush.msrb.mxu3 %v1466_v12 }
  0x2e   : > { %1058 = vmatmul.msk.f32.gmra.mxu3 %vm512_vm3, %v473_v50  ;;  %v300_v50 = vsel %vm299_vm1, %v297_v37, %v298_v33  ;;  %v304_v33 = vsel %vm299_vm1, %v293_v45, %v294_v4 }
  0x2f   : > { %1086 = vmatmul.msk.f32.gmra.mxu2 %vm512_vm3, %v248_v46  ;;  %1118 = vmatpush.msrb.mxu3 %v1492_v18 }
  0x31   : > { %1046 = vmatmul.msk.f32.gmra.mxu0 %vm512_vm3, %v485_v52  ;;  %1119 = vmatpush.msrb.mxu3 %v1501_v20  ;;  %v296_v20 = vrot.slane %v1570_v42, 6 }
  0x32   : > { %1062 = vmatmul.msk.f32.gmra.mxu1 %vm512_vm3, %v314_v53 }
  0x33   : > { %1120 = vmatpush.msrb.mxu3 %v447_v30  ;;  %v302_v30 = vsel %vm299_vm1, %v295_v5, %v296_v20  ;;  %v301_v44 = vsel %vm299_vm1, %v296_v20, %v297_v37 }
  0x35   : > { %1121 = vmatpush.msrb.mxu3 %v446_v43  ;;  %v464_v43 = vrot.slane %v257_v40, 7 }
  0x36   : > { %1059 = vmatmul.msk.f32.gmra.mxu3 %vm512_vm3, %v472_v58 }
  0x37   : > { %1087 = vmatmul.msk.f32.gmra.mxu2 %vm512_vm3, %v249_v54  ;;  %1122 = vmatpush.msra.mxu3 %v1407_v1  ;;  %v483_v1 = vsel %vm470_vm0, %v456_v56, %v457_v62  ;;  %v476_v48 = vsel %vm470_vm0, %v463_v28, %v464_v43  ;;  %v475_v54 = vsel %vm470_vm0, %v464_v43, %v465_v25 }
  0x39   : > { %1047 = vmatmul.msk.f32.gmra.mxu0 %vm512_vm3, %v484_v59  ;;  %1123 = vmatpush.msra.mxu3 %v1420_v3  ;;  %v251_v3 = vld [vmem:[%s1506_s10 + $0x20] sm:$0xff] }
  0x3a   : > { %1063 = vmatmul.msk.f32.gmra.mxu1 %vm512_vm3, %v313_v60  ;;  %v458_v6 = vrot.slane %v251_v3, 7  ;;  %v287_v9 = vrot.slane %v251_v3, 6 }
  0x3b   : > { %1124 = vmatpush.msra.mxu3 %v1435_v7  ;;  %v254_v7 = vld [vmem:[%s1506_s10 + $0x38] sm:$0xff] }
  0x3c   : > { %v461_v12 = vrot.slane %v254_v7, 7  ;;  %v311_v16 = vsel %vm299_vm1, %v286_v63, %v287_v9  ;;  %v290_v18 = vrot.slane %v254_v7, 6 }
  0x3d   : > { %1125 = vmatpush.msra.mxu3 %v1459_v11  ;;  %v303_v11 = vsel %vm299_vm1, %v294_v4, %v295_v5 }
  0x3e   : > { %1060 = vmatmul.msk.f32.gmra.mxu3 %vm512_vm3, %v471_v0  ;;  %v478_v19 = vsel %vm470_vm0, %v461_v12, %v462_v10  ;;  %v307_v23 = vsel %vm299_vm1, %v290_v18, %v291_v14 }
  0x3f   : > { %1088 = vmatmul.msk.f32.gmra.mxu2 %vm512_vm3, %v250_v61  ;;  %1126 = vmatpush.msra.mxu3 %v1478_v15  ;;  %v482_v15 = vsel %vm470_vm0, %v457_v62, %v458_v6 }
  0x41   : > { %1048 = vmatmul.msk.f32.gmra.mxu0 %vm512_vm3, %v483_v1  ;;  %1127 = vmatpush.msra.mxu3 %v1487_v17  ;;  %v252_v17 = vld [vmem:[%s1506_s10 + $0x28] sm:$0xff] }
  0x42   : > { %1064 = vmatmul.msk.f32.gmra.mxu1 %vm512_vm3, %v312_v2  ;;  %v288_v27 = vrot.slane %v252_v17, 6 }
  0x43   : > { %1128 = vmatpush.msra.mxu3 %v1528_v24  ;;  %v459_v24 = vrot.slane %v252_v17, 7 }
  0x44   : > { %v310_v34 = vsel %vm299_vm1, %v287_v9, %v288_v27 }
  0x45   : > { %1129 = vmatpush.msra.mxu3 %v1551_v35  ;;  %v481_v32 = vsel %vm470_vm0, %v458_v6, %v459_v24  ;;  %v253_v35 = vld [vmem:[%s1506_s10 + $0x30] sm:$0xff]  ;;  %s228_s10 = sand.u32 1, %s1277_s16  }
  0x46   : > { %1073 = vmatmul.msk.f32.vlgmr.msrb.gmra.mxu3 %vm512_vm3, %v303_v11  ;;  %v460_v39 = vrot.slane %v253_v35, 7  ;;  %v289_v41 = vrot.slane %v253_v35, 6  ;;  %s1032_s27 = sshll.u32 %s228_s10, 7  ;;  %s914_s13 = scalar_lea.sflag [#allocation3], %s228_s10 }
  0x47   : > { %1089 = vmatmul.msk.f32.gmra.mxu2 %vm512_vm3, %v251_v3  ;;  %s1744_s18 = scalar_lea.vmem [#allocation2], %s1032_s27  ;;  %s1223_s27 = scalar_lea.hbm %s1222_s23, 128 }
  0x48   : > { %v480_v46 = vsel %vm470_vm0, %v459_v24, %v460_v39  ;;  %v309_v47 = vsel %vm299_vm1, %v288_v27, %v289_v41  ;;  %v479_v52 = vsel %vm470_vm0, %v460_v39, %v461_v12  ;;  %v308_v53 = vsel %vm299_vm1, %v289_v41, %v290_v18  ;;  %s928_s5 = sshll.u32 %s1744_s18, 4  ;;  %p1224_p0 = scmp.ne.s32.totalorder %s1222_s23, %s1223_s27  ;;  %s929_s5 = int_to_ptr.vmem [resolvable:$true] %s928_s5 }
  0x49   : > { %1049 = vmatmul.msk.f32.gmra.mxu0 %vm512_vm3, %v482_v15  ;;  %p1229_p5 = scmp.lt.s32.totalorder %s1227_s11, %s1223_s27 }
  0x4a   : > { %1065 = vmatmul.msk.f32.gmra.mxu1 %vm512_vm3, %v311_v16  ;;  %p1225_p1 = pnand %p1224_p0, %p1381_p3 }
  0x4b   : > { %p1230_p6 = por %p1229_p5, %p1228_p4 }
  0x4c   : > { %p1226_p2 = pneg %p1225_p1 }
  0x4e   : > { %1074 = vmatmul.msk.f32.gmra.mxu3 %vm512_vm3, %v302_v30  ;;  %p1231_p7 = pnand %p1230_p6, %p1226_p2 }
  0x4f   : > { %1090 = vmatmul.msk.f32.gmra.mxu2 %vm512_vm3, %v252_v17 }
  0x51   : > { %1050 = vmatmul.msk.f32.gmra.mxu0 %vm512_vm3, %v481_v32 }
  0x52   : > { %1066 = vmatmul.msk.f32.gmra.mxu1 %vm512_vm3, %v310_v34 }
  0x56   : > { %1075 = vmatmul.msk.f32.gmra.mxu3 %vm512_vm3, %v301_v44 }
  0x57   : > { %1091 = vmatmul.msk.f32.gmra.mxu2 %vm512_vm3, %v253_v35 }
  0x59   : > { %1051 = vmatmul.msk.f32.gmra.mxu0 %vm512_vm3, %v480_v46 }
  0x5a   : > { %1067 = vmatmul.msk.f32.gmra.mxu1 %vm512_vm3, %v309_v47 }
  0x5e   : > { %1076 = vmatmul.msk.f32.gmra.mxu3 %vm512_vm3, %v300_v50 }
  0x5f   : > { %1092 = vmatmul.msk.f32.gmra.mxu2 %vm512_vm3, %v254_v7 }
  0x61   : > { %1052 = vmatmul.msk.f32.gmra.mxu0 %vm512_vm3, %v479_v52 }
  0x62   : > { %1068 = vmatmul.msk.f32.gmra.mxu1 %vm512_vm3, %v308_v53 }
  0x66   : > { %1097 = vmatmul.msk.f32.vlgmr.msra.gmra.mxu3 %vm512_vm3, %v1513_v22 }
  0x67   : > { %1093 = vmatmul.msk.f32.gmra.mxu2 %vm512_vm3, %v255_v8 }
  0x69   : > { %1053 = vmatmul.msk.f32.gmra.mxu0 %vm512_vm3, %v478_v19 }
  0x6a   : > { %1069 = vmatmul.msk.f32.gmra.mxu1 %vm512_vm3, %v307_v23 }
  0x6e   : > { %1098 = vmatmul.msk.f32.gmra.mxu3 %vm512_vm3, %v1570_v42  ;;  %v1739_v42 = vld [vmem:[%s1836_s3] ss:$0 sm:$0xff] }
  0x6f   : > { %1094 = vmatmul.msk.f32.gmra.mxu2 %vm512_vm3, %v256_v26 }
  0x71   : > { %1054 = vmatmul.msk.f32.gmra.mxu0 %vm512_vm3, %v477_v36 }
  0x72   : > { %1070 = vmatmul.msk.f32.gmra.mxu1 %vm512_vm3, %v306_v38 }
  0x76   : > { %1099 = vmatmul.msk.f32.gmra.mxu3 %vm512_vm3, %v1591_v51 }
  0x77   : > { %1095 = vmatmul.msk.f32.gmra.mxu2 %vm512_vm3, %v257_v40 }
  0x79   : > { %1055 = vmatmul.msk.f32.gmra.mxu0 %vm512_vm3, %v476_v48 }
  0x7a   : > { %1071 = vmatmul.msk.f32.gmra.mxu1 %vm512_vm3, %v305_v49 }
  0x7e   : > { %1100 = vmatmul.msk.f32.gmra.mxu3 %vm512_vm3, %v1535_v29 }
  0x7f   : > { %1096 = vmatmul.msk.f32.gmra.mxu2 %vm512_vm3, %v1510_v21 }
  0x81   : > { %1056 = vmatmul.msk.f32.gmra.mxu0 %vm512_vm3, %v475_v54 }
  0x82   : > { %1072 = vmatmul.msk.f32.gmra.mxu1 %vm512_vm3, %v304_v33 }
  0xa6   : > { %v578_v13 = vpop.f32.mrf.mxu0 }
  0xa7   : > { %v691_v22 = vpop.f32.mrf.mxu1 }
  0xa8   : > { %v692_v25 = vadd.f32 %v691_v22, %v578_v13 }
  0xa9   : > { %v1741_v51 = vpop.f32.mrf.mxu3 }
  0xaa   : > { %v813_v21 = vpop.f32.mrf.mxu2 }
  0xab   : > { %v861_v55 = vadd.f32 %v813_v21, %v692_v25 }
  0xad   : > { %v881_v29 = vadd.f32 %v1739_v42, %v861_v55 }
  0xae   : > { %v581_v56 = vpop.f32.mrf.mxu0 }
  0xaf   : > { %897 = vst [vmem:[%s1744_s18] sm:$0xff] %v881_v29  ;;  %v694_v57 = vpop.f32.mrf.mxu1 }
  0xb0   : > { %v695_v58 = vadd.f32 %v694_v57, %v581_v56 }
  0xb1   : > { %v1747_v59 = vpop.f32.mrf.mxu3 }
  0xb2   : > { %v816_v60 = vpop.f32.mrf.mxu2 }
  0xb3   : > { %v862_v61 = vadd.f32 %v816_v60, %v695_v58 }
  0xb5   : > { %v882_v62 = vadd.f32 %v1739_v42, %v862_v61 }
  0xb6   : > { %v584_v63 = vpop.f32.mrf.mxu0 }
  0xb7   : > { %898 = vst [vmem:[%s1744_s18 + $0x8] sm:$0xff] %v882_v62  ;;  %v697_v0 = vpop.f32.mrf.mxu1 }
  0xb8   : > { %v698_v1 = vadd.f32 %v697_v0, %v584_v63 }
  0xb9   : > { %v1751_v2 = vpop.f32.mrf.mxu3 }
  0xba   : > { %v819_v3 = vpop.f32.mrf.mxu2 }
  0xbb   : > { %v863_v4 = vadd.f32 %v819_v3, %v698_v1 }
  0xbd   : > { %v883_v5 = vadd.f32 %v1739_v42, %v863_v4 }
  0xbe   : > { %v587_v6 = vpop.f32.mrf.mxu0 }
  0xbf   : > { %899 = vst [vmem:[%s1744_s18 + $0x10] sm:$0xff] %v883_v5  ;;  %v700_v7 = vpop.f32.mrf.mxu1 }
  0xc0   : > { %v701_v8 = vadd.f32 %v700_v7, %v587_v6 }
  0xc1   : > { %v1755_v9 = vpop.f32.mrf.mxu3 }
  0xc2   : > { %v822_v10 = vpop.f32.mrf.mxu2 }
  0xc3   : > { %v864_v11 = vadd.f32 %v822_v10, %v701_v8 }
  0xc5   : > { %v884_v12 = vadd.f32 %v1739_v42, %v864_v11 }
  0xc6   : > { %v590_v14 = vpop.f32.mrf.mxu0 }
  0xc7   : > { %900 = vst [vmem:[%s1744_s18 + $0x18] sm:$0xff] %v884_v12  ;;  %v703_v15 = vpop.f32.mrf.mxu1 }
  0xc8   : > { %v704_v16 = vadd.f32 %v703_v15, %v590_v14 }
  0xc9   : > { %v727_v17 = vpop.f32.mrf.mxu3 }
  0xca   : > { %v825_v18 = vpop.f32.mrf.mxu2  ;;  %v728_v52 = vadd.f32 %v727_v17, %v1741_v51 }
  0xcb   : > { %v865_v19 = vadd.f32 %v825_v18, %v704_v16 }
  0xcd   : > { %v885_v20 = vadd.f32 %v1739_v42, %v865_v19 }
  0xce   : > { %v593_v23 = vpop.f32.mrf.mxu0 }
  0xcf   : > { %901 = vst [vmem:[%s1744_s18 + $0x20] sm:$0xff] %v885_v20  ;;  %v706_v24 = vpop.f32.mrf.mxu1 }
  0xd0   : > { %v707_v26 = vadd.f32 %v706_v24, %v593_v23 }
  0xd1   : > { %v730_v27 = vpop.f32.mrf.mxu3 }
  0xd2   : > { %v828_v28 = vpop.f32.mrf.mxu2  ;;  %v731_v56 = vadd.f32 %v730_v27, %v1747_v59 }
  0xd3   : > { %v866_v30 = vadd.f32 %v828_v28, %v707_v26 }
  0xd5   : > { %v886_v31 = vadd.f32 %v1739_v42, %v866_v30 }
  0xd6   : > { %v596_v32 = vpop.f32.mrf.mxu0 }
  0xd7   : > { %902 = vst [vmem:[%s1744_s18 + $0x28] sm:$0xff] %v886_v31  ;;  %v709_v34 = vpop.f32.mrf.mxu1 }
  0xd8   : > { %v710_v35 = vadd.f32 %v709_v34, %v596_v32 }
  0xd9   : > { %v733_v36 = vpop.f32.mrf.mxu3 }
  0xda   : > { %v831_v37 = vpop.f32.mrf.mxu2  ;;  %v734_v3 = vadd.f32 %v733_v36, %v1751_v2 }
  0xdb   : > { %v867_v38 = vadd.f32 %v831_v37, %v710_v35 }
  0xdd   : > { %v887_v39 = vadd.f32 %v1739_v42, %v867_v38 }
  0xde   : > { %v599_v40 = vpop.f32.mrf.mxu0 }
  0xdf   : > { %903 = vst [vmem:[%s1744_s18 + $0x30] sm:$0xff] %v887_v39  ;;  %v712_v41 = vpop.f32.mrf.mxu1 }
  0xe0   : > { %v713_v43 = vadd.f32 %v712_v41, %v599_v40 }
  0xe1   : > { %v736_v44 = vpop.f32.mrf.mxu3 }
  0xe2   : > { %v834_v45 = vpop.f32.mrf.mxu2  ;;  %v737_v12 = vadd.f32 %v736_v44, %v1755_v9 }
  0xe3   : > { %v868_v46 = vadd.f32 %v834_v45, %v713_v43 }
  0xe5   : > { %v888_v47 = vadd.f32 %v1739_v42, %v868_v46 }
  0xe6   : > { %v602_v48 = vpop.f32.mrf.mxu0 }
  0xe7   : > { %904 = vst [vmem:[%s1744_s18 + $0x38] sm:$0xff] %v888_v47  ;;  %v715_v49 = vpop.f32.mrf.mxu1 }
  0xe8   : > { %v716_v50 = vadd.f32 %v715_v49, %v602_v48 }
  0xe9   : > { %v849_v54 = vpop.f32.mrf.mxu3 }
  0xea   : > { %v837_v53 = vpop.f32.mrf.mxu2  ;;  %v873_v13 = vadd.f32 %v849_v54, %v728_v52 }
  0xeb   : > { %v869_v33 = vadd.f32 %v837_v53, %v716_v50 }
  0xec   : > { %v893_v25 = vadd.f32 %v1739_v42, %v873_v13 }
  0xed   : > { %v889_v22 = vadd.f32 %v1739_v42, %v869_v33 }
  0xee   : > { %v605_v21 = vpop.f32.mrf.mxu0  ;;  %909 = vst [vmem:[%s1744_s18 + $0x60] sm:$0xff] %v893_v25 }
  0xef   : > { %905 = vst [vmem:[%s1744_s18 + $0x40] sm:$0xff] %v889_v22  ;;  %v718_v55 = vpop.f32.mrf.mxu1 }
  0xf0   : > { %v719_v29 = vadd.f32 %v718_v55, %v605_v21 }
  0xf1   : > { %v852_v57 = vpop.f32.mrf.mxu3 }
  0xf2   : > { %v840_v51 = vpop.f32.mrf.mxu2  ;;  %v874_v60 = vadd.f32 %v852_v57, %v731_v56 }
  0xf3   : > { %v870_v58 = vadd.f32 %v840_v51, %v719_v29 }
  0xf4   : > { %v894_v62 = vadd.f32 %v1739_v42, %v874_v60 }
  0xf5   : > { %v890_v61 = vadd.f32 %v1739_v42, %v870_v58 }
  0xf6   : > { %v608_v63 = vpop.f32.mrf.mxu0  ;;  %910 = vst [vmem:[%s1744_s18 + $0x68] sm:$0xff] %v894_v62 }
  0xf7   : > { %906 = vst [vmem:[%s1744_s18 + $0x48] sm:$0xff] %v890_v61  ;;  %v721_v0 = vpop.f32.mrf.mxu1 }
  0xf8   : > { %v722_v1 = vadd.f32 %v721_v0, %v608_v63 }
  0xf9   : > { %v855_v4 = vpop.f32.mrf.mxu3 }
  0xfa   : > { %v843_v59 = vpop.f32.mrf.mxu2  ;;  %v875_v6 = vadd.f32 %v855_v4, %v734_v3 }
  0xfb   : > { %v871_v5 = vadd.f32 %v843_v59, %v722_v1 }
  0xfc   : > { %v895_v8 = vadd.f32 %v1739_v42, %v875_v6 }
  0xfd   : > { %v891_v7 = vadd.f32 %v1739_v42, %v871_v5 }
  0xfe   : > { %v611_v10 = vpop.f32.mrf.mxu0  ;;  %911 = vst [vmem:[%s1744_s18 + $0x70] sm:$0xff] %v895_v8 }
  0xff   : > { %907 = vst [vmem:[%s1744_s18 + $0x50] sm:$0xff] %v891_v7  ;;  %v724_v11 = vpop.f32.mrf.mxu1 }
 0x100   : > { %v725_v2 = vadd.f32 %v724_v11, %v611_v10 }
 0x101   : > { %v858_v15 = vpop.f32.mrf.mxu3 }
 0x102   : > { %v846_v14 = vpop.f32.mrf.mxu2  ;;  %v876_v17 = vadd.f32 %v858_v15, %v737_v12 }
 0x103   : > { %v872_v16 = vadd.f32 %v846_v14, %v725_v2 }
 0x104   : > { %v896_v19 = vadd.f32 %v1739_v42, %v876_v17 }
 0x105   : > { %v892_v18 = vadd.f32 %v1739_v42, %v872_v16 }
 0x106   : > { %912 = vst [vmem:[%s1744_s18 + $0x78] sm:$0xff] %v896_v19 }
 0x107   : > { %908 = vst [vmem:[%s1744_s18 + $0x58] sm:$0xff] %v892_v18 }
 0x108   : > { %1234 = shalt.err (!%p1231_p7)
}
 0x109   : > { %s1303_s10 = smov 128   ;;  %s1304_s18 = smov 8  }
 0x10a   : > { %1133 = dma.vmem_to_hbm [thread:$0]  (%p1381_p3), %s929_s5, 2048, %s931_s14, %s914_s13, %s1303_s10, %s1303_s10, %s1304_s18  }
 0x10b PF: > { %p1139_p9 = scmp.ge.s32.totalorder %s1301_s22, 2  ;;  %s945_s19 = sand.u32 1, %s1273_s15  }
 0x10c   : > { %s946_s9 = scalar_lea.sflag [#allocation3], %s945_s19 }
 0x10d   : > { %p1136_p10 = pnand %p1139_p9, %p1390_p8 }
 0x10f   : > { %p1137_p11 = pneg %p1136_p10 }
 0x111   : > { %1268 = dma.done.wait (%p1137_p11), %s946_s9, 2048  }
 0x112   : > { %1270 = vsyncadd (%p1137_p11), %s946_s9, 4294965248  ;;  %s17_s22 = sadd.s32 1, %s1301_s22   ;;  %s1840_s15 = smov %s1277_s16 }
 0x113   : > { %p14_p12 = scmp.ge.s32.totalorder %s17_s22, 8   ;;  %s1841_s16 = smov %s1281_s17 }
 0x114   : > { %s1842_s17 = smov %s1399_s7  ;;  %s1843_s18 = smov %s1293_s20 }
 0x115   : > { %s1844_s19 = smov %s1297_s21  ;;  %s1845_s20 = smov %s1848_s25 }
 0x116   : > { %s1846_s21 = smov %s1852_s26  ;;  %16 = sbr.rel (!%p14_p12) target bundleno = 5 (0x5), region = 77 }
 0x11b   :  { %952 = vsyncpa [#allocation3], 1 }
 0x11c   :  { %954 = vsyncpa [#allocation3 + $0x1], 1 }

</bundles_post_ra>
